<compile_context>
chip_gen: v7x
topology: tpu7x:2x2x1
jax: 0.10.0
libtpu: 0.0.40
codegen_flags: <defaults>
</compile_context>

<pallas_src>
import functools

import jax
import jax.numpy as jnp
from jax.experimental import pallas as pl
from jax.experimental.pallas import tpu as pltpu

LANES = 128
# f32 working-set budget per input per pipeline buffer (~4 MiB -> 8192 rows).
_TILE_BYTES_F32 = 4 * 1024 * 1024
_MAX_TILE_R = _TILE_BYTES_F32 // (LANES * 4)          # 8192 rows
_VMEM_LIMIT_BYTES = 48 * 1024 * 1024                  # fits v5e/v6e/v7x
_MIN_STEPS_PER_SPLIT = 4


def _cdiv(a: int, b: int) -> int:
    return -(-a // b)


def _round_up(x: int, m: int) -> int:
    return _cdiv(x, m) * m


def _num_tensorcores_per_device() -> int:
    """Best-effort TensorCore count of one addressable device.

    v5e / v6e expose a single TensorCore per device; v4 / v5p / v7x expose two
    (megacore-style), which the "parallel" grid axis can shard across.
    Unknown hardware conservatively returns 1 (always correct).
    """
    try:
        kind = jax.devices()[0].device_kind.lower()
    except Exception:  # pragma: no cover
        return 1
    if any(s in kind for s in ("lite", "v5e", "v6e", "trillium", "v6")):
        return 1
    if any(s in kind for s in ("v7", "v5p", "v5", "v4")):
        return 2
    return 1


def _mape_kernel(p_ref, t_ref, o_ref, *, valid_rows, tile_r, tiles_per_split,
                 n_tiles, needs_mask):
    c = pl.program_id(0)   # core-split axis ("parallel")
    i = pl.program_id(1)   # reduction axis  ("arbitrary")

    # o_ref is the VMEM-resident (8, 128) accumulator for this core-split
    # (same output block for every i); zero it at the start of each sweep.
    @pl.when(i == 0)
    def _():
        o_ref[...] = jnp.zeros_like(o_ref)

    p = p_ref[...].astype(jnp.float32)
    t = t_ref[...].astype(jnp.float32)
    # (t - p) * (1 / t): exact reciprocal rides the EUP slot.
    err = jnp.abs((t - p) * pl.reciprocal(t))

    def _fold(x):
        # Fold the (tile_r, 128) tile into the (8, 128) accumulator with pure
        # elementwise VPU adds (no per-step cross-lane reduce).
        o_ref[...] += x.reshape(tile_r // 8, 8, LANES).sum(axis=0)

    if not needs_mask:
        _fold(err)
    else:
        tile_idx = c * tiles_per_split + i          # unclamped global tile id
        is_interior = tile_idx < n_tiles - 1

        @pl.when(is_interior)
        def _():
            _fold(err)                               # bulk tiles: no mask

        @pl.when(jnp.logical_not(is_interior))
        def _():
            # Edge / duplicated tile: mask rows beyond the valid slab. Keep a
            # select (NOT a multiply): garbage rows may hold t == 0 -> inf/NaN.
            row_ids = tile_idx * tile_r + jax.lax.broadcasted_iota(
                jnp.int32, (tile_r, LANES), 0)
            _fold(jnp.where(row_ids < valid_rows, err, jnp.float32(0.0)))


def mape_loss(predictions: jax.Array, targets: jax.Array) -> jax.Array:
    """MAPE loss = mean(|(targets - predictions) / targets|)."""
    assert predictions.shape == targets.shape
    n = predictions.size

    p = predictions.reshape(-1)
    t = targets.reshape(-1)

    rows = n // LANES
    rem = n - rows * LANES

    # < 128-element tail (N not lane aligned): summed with plain JAX and added
    # to the kernel partials -- no full-array pad/concatenate.
    tail = jnp.float32(0.0)
    if rem:
        pt = jax.lax.slice(p, (rows * LANES,), (n,)).astype(jnp.float32)
        tt = jax.lax.slice(t, (rows * LANES,), (n,)).astype(jnp.float32)
        tail = jnp.sum(jnp.abs((tt - pt) / tt))

    if rows == 0:
        return (tail / jnp.float32(n)).astype(jnp.float32)

    if rem:
        # Single slice of the lane-aligned prefix (the zero-copy reshape path
        # is taken whenever N % 128 == 0).
        p = jax.lax.slice(p, (0,), (rows * LANES,))
        t = jax.lax.slice(t, (0,), (rows * LANES,))
    p2 = p.reshape(rows, LANES)
    t2 = t.reshape(rows, LANES)

    # Sublane multiple for the native dtype (8 for f32, 16 for bf16, ...).
    itemsize = min(int(p2.dtype.itemsize), int(t2.dtype.itemsize))
    sub = max(8, 32 // max(itemsize, 1))

    # Split across TensorCores only where the hardware has two per device.
    tc = _num_tensorcores_per_device()

    # Big tiles (HBM-roofline bound), but keep >= ~4 grid steps per split so
    # the BlockSpec double-buffer reaches steady state on medium inputs.
    tile_r = max(sub, min(_MAX_TILE_R,
                          _round_up(_cdiv(rows, tc * _MIN_STEPS_PER_SPLIT), sub)))
    n_tiles = _cdiv(rows, tile_r)

    # On 2-TC chips prefer an even tile count so the split needs no clamped
    # duplicate tile (which would cost a wasted 2 x tile_r x 128 HBM read).
    if tc >= 2 and n_tiles > 1 and n_tiles % 2 != 0:
        alt = max(sub, min(_MAX_TILE_R,
                           _round_up(_cdiv(rows, n_tiles + 1), sub)))
        if _cdiv(rows, alt) % 2 == 0:
            tile_r = alt
            n_tiles = _cdiv(rows, alt)

    num_splits = 2 if (tc >= 2 and n_tiles >= 2) else 1
    tiles_per_split = _cdiv(n_tiles, num_splits)
    exact_split = (num_splits * tiles_per_split == n_tiles)
    needs_mask = (rows % tile_r != 0) or (not exact_split)

    if exact_split:
        def in_map(c, i):
            return (c * tiles_per_split + i, 0)
    else:
        def in_map(c, i):
            # Clamp duplicate tail steps onto the last valid tile (masked to 0
            # inside the kernel).
            return (jnp.minimum(c * tiles_per_split + i, n_tiles - 1), 0)

    kernel = functools.partial(
        _mape_kernel,
        valid_rows=rows,
        tile_r=tile_r,
        tiles_per_split=tiles_per_split,
        n_tiles=n_tiles,
        needs_mask=needs_mask,
    )

    bytes_accessed = (rows * LANES *
                      (int(p2.dtype.itemsize) + int(t2.dtype.itemsize))
                      + num_splits * 8 * LANES * 4)

    partials = pl.pallas_call(
        kernel,
        out_shape=jax.ShapeDtypeStruct((num_splits, 8, LANES), jnp.float32),
        grid_spec=pltpu.PrefetchScalarGridSpec(
            num_scalar_prefetch=0,
            grid=(num_splits, tiles_per_split),
            in_specs=[
                pl.BlockSpec((tile_r, LANES), in_map),
                pl.BlockSpec((tile_r, LANES), in_map),
            ],
            out_specs=pl.BlockSpec((None, 8, LANES), lambda c, i: (c, 0, 0)),
        ),
        compiler_params=pltpu.CompilerParams(
            dimension_semantics=("parallel", "arbitrary"),
            vmem_limit_bytes=_VMEM_LIMIT_BYTES,
        ),
        cost_estimate=pl.CostEstimate(
            flops=5 * rows * LANES,
            transcendentals=rows * LANES,
            bytes_accessed=int(bytes_accessed),
        ),
    )(p2, t2)

    total = jnp.sum(partials) + tail
    return (total / jnp.float32(n)).astype(jnp.float32)


if __name__ == "__main__":
    key = jax.random.PRNGKey(0)
    kp, kt = jax.random.split(key)

    # Small shape consistent with a generic regression output.
    shape = (2, 4, 16, 16)
    predictions = jax.random.normal(kp, shape, dtype=jnp.float32)
    # Keep targets away from zero (division semantics match torch otherwise).
    targets = jax.random.normal(kt, shape, dtype=jnp.float32) + 3.0

    loss = mape_loss(predictions, targets)
    jax.block_until_ready(loss)

    # Cross-check against plain JAX reference.
    ref = jnp.mean(jnp.abs((targets - predictions) / targets))
    assert jnp.allclose(loss, ref, rtol=1e-5, atol=1e-6), (loss, ref)

    print("KERNEL_OK")
</pallas_src>

<mosaic_0001>
module attributes {stable_mosaic.version = 11 : i64} {
  func.func @_mape_kernel(%arg0: i32, %arg1: i32, %arg2: memref<8x128xf32, #tpu.memory_space<vmem>>, %arg3: memref<8x128xf32, #tpu.memory_space<vmem>>, %arg4: memref<1x8x128xf32, #tpu.memory_space<vmem>>) attributes {dimension_semantics = [#tpu.dimension_semantics<parallel>, #tpu.dimension_semantics<arbitrary>], iteration_bounds = array<i64: 1, 2>, scalar_prefetch = 0 : i64, scratch_operands = 0 : i64, tpu.core_type = #tpu.core_type<tc>, window_params = [{transform_indices = @transform_0, window_bounds = array<i64: 8, 128>}, {transform_indices = @transform_1, window_bounds = array<i64: 8, 128>}, {transform_indices = @transform_2, window_bounds = array<i64: 1, 8, 128>}]} {
    %c0_i32 = arith.constant 0 : i32
    %0 = arith.cmpi eq, %arg1, %c0_i32 : i32
    %1 = arith.extui %0 : i1 to i32
    %c0_i32_0 = arith.constant 0 : i32
    %2 = arith.cmpi ne, %1, %c0_i32_0 : i32
    scf.if %2 {
      %cst_10 = arith.constant 0.000000e+00 : f32
      %17 = vector.broadcast %cst_10 : f32 to vector<8x128xf32>
      %c0_11 = arith.constant 0 : index
      %c0_12 = arith.constant 0 : index
      %c0_13 = arith.constant 0 : index
      %18 = vector.load %arg4[%c0_11, %c0_12, %c0_13] : memref<1x8x128xf32, #tpu.memory_space<vmem>>, vector<1x8x128xf32>
      %19 = vector.shape_cast %18 : vector<1x8x128xf32> to vector<8x128xf32>
      %20 = vector.shape_cast %17 : vector<8x128xf32> to vector<1x8x128xf32>
      tpu.vector_store %arg4[%c0_11, %c0_12, %c0_13], %20 {strides = array<i32>} : memref<1x8x128xf32, #tpu.memory_space<vmem>>, vector<1x8x128xf32>,
    } else {
    }
    %c0 = arith.constant 0 : index
    %c0_1 = arith.constant 0 : index
    %3 = vector.load %arg2[%c0, %c0_1] : memref<8x128xf32, #tpu.memory_space<vmem>>, vector<8x128xf32>
    %c0_2 = arith.constant 0 : index
    %c0_3 = arith.constant 0 : index
    %4 = vector.load %arg3[%c0_2, %c0_3] : memref<8x128xf32, #tpu.memory_space<vmem>>, vector<8x128xf32>
    %5 = arith.subf %4, %3 : vector<8x128xf32>
    %6 = tpu.reciprocal %4 : vector<8x128xf32> -> vector<8x128xf32>
    %7 = arith.mulf %5, %6 : vector<8x128xf32>
    %8 = math.absf %7 : vector<8x128xf32>
    %c0_4 = arith.constant 0 : index
    %c0_5 = arith.constant 0 : index
    %c0_6 = arith.constant 0 : index
    %9 = vector.load %arg4[%c0_4, %c0_5, %c0_6] : memref<1x8x128xf32, #tpu.memory_space<vmem>>, vector<1x8x128xf32>
    %10 = vector.shape_cast %9 : vector<1x8x128xf32> to vector<8x128xf32>
    %11 = vector.shape_cast %8 : vector<8x128xf32> to vector<1x8x128xf32>
    %cst = arith.constant dense<0.000000e+00> : vector<8x128xf32>
    %12 = vector.multi_reduction <add>, %11, %cst [0] : vector<1x8x128xf32> to vector<8x128xf32>
    %13 = arith.addf %10, %12 : vector<8x128xf32>
    %c0_7 = arith.constant 0 : index
    %c0_8 = arith.constant 0 : index
    %c0_9 = arith.constant 0 : index
    %14 = vector.load %arg4[%c0_7, %c0_8, %c0_9] : memref<1x8x128xf32, #tpu.memory_space<vmem>>, vector<1x8x128xf32>
    %15 = vector.shape_cast %14 : vector<1x8x128xf32> to vector<8x128xf32>
    %16 = vector.shape_cast %13 : vector<8x128xf32> to vector<1x8x128xf32>
    tpu.vector_store %arg4[%c0_7, %c0_8, %c0_9], %16 {strides = array<i32>} : memref<1x8x128xf32, #tpu.memory_space<vmem>>, vector<1x8x128xf32>,
    return
  }
  func.func @transform_0(%arg0: i32, %arg1: i32) -> (i32, i32) {
    %c2_i32 = arith.constant 2 : i32
    %0 = arith.muli %arg0, %c2_i32 : i32
    %1 = arith.addi %0, %arg1 : i32
    %c0_i32 = arith.constant 0 : i32
    %c0_i32_0 = arith.constant 0 : i32
    return %1, %c0_i32 : i32, i32
  }
  func.func @transform_1(%arg0: i32, %arg1: i32) -> (i32, i32) {
    %c2_i32 = arith.constant 2 : i32
    %0 = arith.muli %arg0, %c2_i32 : i32
    %1 = arith.addi %0, %arg1 : i32
    %c0_i32 = arith.constant 0 : i32
    %c0_i32_0 = arith.constant 0 : i32
    return %1, %c0_i32 : i32, i32
  }
  func.func @transform_2(%arg0: i32, %arg1: i32) -> (i32, i32, i32) {
    %c0_i32 = arith.constant 0 : i32
    %c0_i32_0 = arith.constant 0 : i32
    %c0_i32_1 = arith.constant 0 : i32
    return %arg0, %c0_i32, %c0_i32_0 : i32, i32, i32
  }
}

</mosaic_0001>

<bundles_post_ra>
// kernel: tpu_custom_call.1
= control target key start
LH: loop header
LB: loop body
LE: loop exit
PB: predicated region body
PF: predicated region fallthrough
CT: control target
= control target key end

     0   :  { %7 = vsyncpa [#allocation3], 0  ;;  %s777_s0 = inlined_call_operand.hbm [shape: f32[16,128], index: 0, kind: input, shape index: {}]   ;;  %s778_s1 = inlined_call_operand.hbm [shape: f32[16,128], index: 1, kind: input, shape index: {}]   ;;  %s779_s2 = inlined_call_operand.hbm [shape: f32[1,8,128], index: 2, kind: output, shape index: {}]  }
   0x1   :  { %9 = vsyncpa [#allocation3 + $0x1], 0 }
   0x2   :  { %10 = vsyncpa [#allocation6], 0 }
   0x3   :  { %12 = vsyncpa [#allocation6 + $0x1], 0 }
   0x4   :  { %13 = vsyncpa [#allocation4], 0  ;;  %s579_s9 = smov 0   ;;  %s581_s10 = smov 0  }
   0x5   :  { %s583_s11 = smov 0   ;;  %s585_s12 = smov 0  }
   0x6   :  { %s587_s13 = smov 0   ;;  %s589_s14 = smov 0  }
   0x7 LB: > { %s329_s15 = sadd.s32 4294967295, %s558_s14   ;;  %s28_s16 = sadd.s32 1, %s554_s13  ;;  %s558_s14 = sphi %s589_s14, %s19_s14   ;;  %s554_s13 = sphi %s587_s13, %s794_s13   ;;  %s550_s12 = sphi %s585_s12, %s793_s12   ;;  %s546_s11 = sphi %s583_s11, %s792_s11   ;;  %s542_s10 = sphi %s581_s10, %s791_s10   ;;  %s538_s9 = sphi %s579_s9, %s790_s9  }
   0x8   : > { %p29_p0 = scmp.ge.s32.totalorder %s28_s16, 2  ;;  %s42_s17 = sadd.s32 1, %s546_s11 }
   0x9   : > { %p49_p1 = scmp.ne.s32.totalorder %s546_s11, %s542_s10  ;;  %p50_p2 = scmp.eq.s32.totalorder %s558_s14, 0 }
   0xa   : > { %s796_s16 = smov (%p29_p0, %s28_s16), 0  ;;  %p55_p4 = scmp.ne.s32.totalorder %s542_s10, %s538_s9 }
   0xb   : > { %p615_p3 = por %p50_p2, %p49_p1  ;;  %s39_s19 = ssub.s32 %s554_s13, %s796_s16 }
   0xc   : > { %p56_p5 = scmp.eq.s32.totalorder %s329_s15, 0  ;;  %p40_p6 = scmp.eq.s32.totalorder %s39_s19, 0 }
   0xd   : > { %p359_p8 = scmp.lt.s32.totalorder %s558_s14, 2  ;;  %s633_s22 = sand.u32 1, %s546_s11  }
   0xe   : > { %p624_p7 = por %p56_p5, %p55_p4  ;;  %s333_s23 = sshll.u32 %s554_s13, 7 }
   0xf   : > { %s630_s21 = scalar_select %p40_p6, %s546_s11, %s42_s17  }
  0x10   : > { %s782_s20 = scalar_select %p624_p7, 1, 0 }
  0x11   : > { %s332_s24 = sshll.u32 %s633_s22, 3  ;;  %s642_s27 = scalar_lea.hbm %s777_s0, %s333_s23 }
  0x12   : > { %s139_s28 = scalar_lea.vmem [#allocation2], %s332_s24  ;;  %p648_p9 = pnand %p359_p8, %p615_p3 }
  0x13   : > { %s148_s29 = sshll.u32 %s139_s28, 4  ;;  %s136_s3 = scalar_lea.sflag [#allocation3], %s633_s22  ;;  %s652_s29 = int_to_ptr.vmem [resolvable:$true] %s148_s29 }
  0x14   : > { %s414_s4 = scalar_lea.hbm %s642_s27, 128  ;;  %p416_p13 = pneg %p648_p9 }
  0x15   : > { %p415_p12 = scmp.ne.s32.totalorder %s642_s27, %s414_s4  ;;  %s419_s7 = scalar_lea.hbm %s777_s0, 256 }
  0x16   : > { %p420_p2 = scmp.lt.u32.totalorder %s642_s27, %s777_s0  ;;  %p421_p3 = scmp.lt.u32.totalorder %s419_s7, %s414_s4 }
  0x17   : > { %p417_p0 = pnand %p416_p13, %p415_p12  ;;  %p423_p5 = scmp.lt.u32.totalorder %s414_s4, %s642_s27 }
  0x18   : > { %p422_p4 = por %p421_p3, %p420_p2 }
  0x19   : > { %p418_p1 = pneg %p417_p0 }
  0x1a   : > { %p424_p6 = por %p423_p5, %p422_p4 }
  0x1c   : > { %p425_p8 = pnand %p424_p6, %p418_p1 }
  0x1e   : > { %428 = shalt.err (!%p425_p8)
}
  0x1f   : > { %s429_s17 = scalar_lea.vmem %s652_s29, 128  ;;  %s560_s18 = smov [#allocation2]  }
  0x20   : > { %p430_p12 = scmp.ne.s32.totalorder %s652_s29, %s429_s17  ;;  %s434_s19 = sshll.u32 %s560_s18, 4  ;;  %s435_s19 = int_to_ptr.vmem [resolvable:$false] %s434_s19 }
  0x21   : > { %s436_s25 = scalar_lea.vmem %s435_s19, 256  ;;  %p437_p11 = scmp.lt.s32.totalorder %s652_s29, %s435_s19 }
  0x22   : > { %p432_p0 = pnand %p430_p12, %p416_p13  ;;  %p438_p2 = scmp.lt.s32.totalorder %s436_s25, %s429_s17 }
  0x24   : > { %p433_p10 = pneg %p432_p0  ;;  %p439_p3 = por %p438_p2, %p437_p11 }
  0x26   : > { %p440_p4 = pnand %p439_p3, %p433_p10 }
  0x28   : > { %443 = shalt.err (!%p440_p4)
}
  0x29   : > { %355 = dma.hbm_to_vmem [thread:$0]  (!%p648_p9), %s642_s27, 128, %s652_s29, %s136_s3  }
  0x2a   : > { %p784_p1 = scmp.lt.s32.totalorder %s558_s14, 3  ;;  %p785_p5 = scmp.ge.s32.totalorder %s558_s14, 1 }
  0x2b   : > { %s695_s5 = scalar_lea.hbm %s778_s1, %s333_s23  ;;  %s159_s6 = scalar_lea.vmem [#allocation5], %s332_s24 }
  0x2c   : > { %p686_p6 = pnand %p785_p5, %p784_p1  ;;  %s168_s7 = sshll.u32 %s159_s6, 4  ;;  %s169_s7 = int_to_ptr.vmem [resolvable:$true] %s168_s7 }
  0x2d   : > { %s156_s27 = scalar_lea.sflag [#allocation6], %s633_s22  ;;  %s444_s29 = scalar_lea.hbm %s695_s5, 128 }
  0x2e   : > { %s786_s26 = scalar_select %p686_p6, 1, 0 }
  0x2f   : > { %p445_p10 = scmp.ne.s32.totalorder %s695_s5, %s444_s29  ;;  %s449_s23 = scalar_lea.hbm %s778_s1, 256 }
  0x30   : > { %p450_p12 = scmp.lt.u32.totalorder %s695_s5, %s778_s1  ;;  %p451_p0 = scmp.lt.u32.totalorder %s449_s23, %s444_s29 }
  0x31   : > { %p447_p11 = pnand %p445_p10, %p416_p13  ;;  %p453_p3 = scmp.lt.u32.totalorder %s444_s29, %s695_s5 }
  0x32   : > { %p452_p2 = por %p451_p0, %p450_p12 }
  0x33   : > { %p448_p8 = pneg %p447_p11 }
  0x34   : > { %p454_p4 = por %p453_p3, %p452_p2 }
  0x36   : > { %p455_p1 = pnand %p454_p4, %p448_p8 }
  0x38   : > { %458 = shalt.err (!%p455_p1)
}
  0x39   : > { %s459_s22 = scalar_lea.vmem %s169_s7, 128  ;;  %s561_s24 = smov [#allocation5]  }
  0x3a   : > { %p460_p5 = scmp.ne.s32.totalorder %s169_s7, %s459_s22  ;;  %s464_s18 = sshll.u32 %s561_s24, 4  ;;  %s465_s18 = int_to_ptr.vmem [resolvable:$false] %s464_s18 }
  0x3b   : > { %s466_s19 = scalar_lea.vmem %s465_s18, 256  ;;  %p467_p7 = scmp.lt.s32.totalorder %s169_s7, %s465_s18 }
  0x3c   : > { %p462_p10 = pnand %p460_p5, %p416_p13  ;;  %p468_p6 = scmp.lt.s32.totalorder %s466_s19, %s459_s22 }
  0x3e   : > { %p463_p11 = pneg %p462_p10  ;;  %p469_p0 = por %p468_p6, %p467_p7 }
  0x40   : > { %p470_p12 = pnand %p469_p0, %p463_p11 }
  0x42   : > { %473 = shalt.err (!%p470_p12)
}
  0x43   : > { %358 = dma.hbm_to_vmem [thread:$0]  (!%p648_p9), %s695_s5, 128, %s169_s7, %s156_s27  }
  0x44   : > { %p787_p8 = scmp.ne.s32.totalorder %s786_s26, 0 }
  0x45   : > { %s179_s25 = sand.u32 (!%p787_p8), 1, %s542_s10   ;;  %p788_p13 = scmp.ne.s32.totalorder (!%p787_p8), %s782_s20, 0 }
  0x46   : > { %177 = sbr.rel (%p787_p8) target bundleno = 122 (0x7a), region = 28  ;;  %s337_s28 = sshll.u32 (!%p787_p8), %s179_s25, 3 }
  0x47   : > { %s180_s4 = scalar_lea.sflag (!%p787_p8), [#allocation3], %s179_s25  ;;  %s183_s6 = scalar_lea.vmem (!%p787_p8), [#allocation2], %s337_s28 }
  0x4d   : > { %525 = dma.done.wait (%p788_p13), %s180_s4, 128  }
  0x4e   : > { %527 = vsyncadd (%p788_p13), %s180_s4, 4294967168  ;;  %s189_s29 = scalar_lea.sflag [#allocation6], %s179_s25  ;;  %s192_s3 = scalar_lea.vmem [#allocation5], %s337_s28 }
  0x4f   : > { %529 = dma.done.wait (%p788_p13), %s189_s29, 128  }
  0x50   : > { %531 = vsyncadd (%p788_p13), %s189_s29, 4294967168  ;;  %p339_p7 = scmp.ne.s32.totalorder %s550_s12, 0 }
  0x51   : > { %v562_v0 = vmov (!%p339_p7), 0.0  }
  0x52   : > { %220 = sbr.rel (%p339_p7) target bundleno = 89 (0x59), region = 40  ;;  %221 = vst [vmem:[#allocation7] sm:$0xff] (!%p339_p7), %v562_v0 }
  0x59 PF: > { %v223_v1 = vld [vmem:[%s192_s3] sm:$0xff]  ;;  %v222_v2 = vld [vmem:[%s183_s6] sm:$0xff]  ;;  %s563_s30 = smov [#allocation7]   ;;  %p733_p9 = scmp.eq.s32.totalorder %s329_s15, 1 }
  0x5a   : > { %412 = vrcp.f32 %v223_v1  ;;  %v224_v3 = vsub.f32 %v223_v1, %v222_v2  ;;  %v228_v6 = vld [vmem:[#allocation7] sm:$0xff]  ;;  %s241_s26 = sshll.u32 %s563_s30, 4  ;;  %s242_s26 = int_to_ptr.vmem [resolvable:$true] %s241_s26 }
  0x5b   : > { %s474_s12 = scalar_lea.vmem %s242_s26, 128  ;;  %p481_p4 = scmp.lt.s32.totalorder %s242_s26, %s242_s26 }
  0x5c   : > { %p475_p6 = scmp.ne.s32.totalorder %s242_s26, %s474_s12  ;;  %p482_p1 = scmp.lt.s32.totalorder %s474_s12, %s474_s12 }
  0x5e   : > { %p476_p2 = pnand %p475_p6, %p733_p9  ;;  %p483_p5 = por %p482_p1, %p481_p4 }
  0x60   : > { %p477_p3 = pneg %p476_p2 }
  0x62   : > { %p484_p10 = pnand %p483_p5, %p477_p3 }
  0x64   : > { %v413_v4 = vpop.eup %412 }
  0x65   : > { %v226_v5 = vmul.f32 %v413_v4, %v224_v3 }
  0x67   : > { %v227_v7 = vand.u32 2147483647, %v226_v5 }
  0x69   : > { %v230_v8 = vadd.f32 %v228_v6, %v227_v7 }
  0x6b   : > { %231 = vst [vmem:[#allocation7] sm:$0xff] %v230_v8 }
  0x6c   : > { %487 = shalt.err (!%p484_p10)
}
  0x6d   : > { %s488_s15 = scalar_lea.hbm %s779_s2, 128 }
  0x6e   : > { %p489_p11 = scmp.ne.s32.totalorder %s779_s2, %s488_s15  ;;  %p494_p8 = scmp.lt.u32.totalorder %s488_s15, %s779_s2 }
  0x70   : > { %p490_p0 = pnand %p489_p11, %p733_p9 }
  0x72   : > { %p491_p12 = pneg %p490_p0 }
  0x74   : > { %p496_p13 = pnand %p494_p8, %p491_p12 }
  0x76   : > { %499 = shalt.err (!%p496_p13)
}
  0x77   : > { %349 = dma.vmem_to_hbm [thread:$0]  (%p733_p9), %s242_s26, 128, %s779_s2, [#allocation4]  }
  0x78   : > { %533 = dma.done.wait (%p733_p9), [#allocation4], 128  }
  0x79   : > { %535 = vsyncadd (%p733_p9), [#allocation4], 4294967168 }
  0x7a PF: > { %s19_s14 = sadd.s32 1, %s558_s14   ;;  %s790_s9 = smov %s542_s10 }
  0x7b   : > { %p16_p7 = scmp.ge.s32.totalorder %s19_s14, 4   ;;  %s791_s10 = smov %s546_s11 }
  0x7c   : > { %s792_s11 = smov %s630_s21  ;;  %s793_s12 = smov %s554_s13 }
  0x7d   : > { %s794_s13 = smov %s796_s16  ;;  %18 = sbr.rel (!%p16_p7) target bundleno = 7 (0x7), region = 83 }
  0x84   :  { %254 = vsyncpa [#allocation3], 1 }
  0x85   :  { %256 = vsyncpa [#allocation3 + $0x1], 1 }
  0x86   :  { %257 = vsyncpa [#allocation6], 1 }
  0x87   :  { %259 = vsyncpa [#allocation6 + $0x1], 1 }
  0x88   :  { %260 = vsyncpa [#allocation4], 1 }
  0x89   :  { %262 = vsyncpa [#allocation4 + $0x1], 1 }

</bundles_post_ra>
